<compile_context>
chip_gen: v6e
topology: v6e:2x2x1
jax: 0.10.0
libtpu: 0.0.40
codegen_flags: <defaults>
</compile_context>

<pallas_src>
import numpy as np
import jax
import jax.numpy as jnp
from jax import lax
from jax.experimental import pallas as pl
from jax.experimental.pallas import tpu as pltpu

H = 8          # spatial size of a plane (see semantics note above)

# Flat (folded) parameter layout: float32 scalars, SMEM-resident in-kernel.
_MSD_W = 0     # (3,3) effective msd conv weight, idx = 3*i + j
_MSD_B = 9     # effective msd bias
_MFD_W = 10    # (3,3) effective mfd conv weight, idx = 3*di + dj
_MFD_B = 19    # effective mfd bias
_FRE_W = 20    # fre 1x1 weight
_FRE_B = 21    # fre bias
_NPARAMS = 22

# Input-row / input-col windows of the 3x3 block of MaxPool2d(3, stride=2,
# padding=1) outputs that the following stride-2 valid 3x3 conv consumes.
# Pool output position p covers input rows [2p-1, 2p+1] clipped to [0, 7].
_POOL_WIN = ((0, 2), (1, 4), (3, 6))


def _model_kernel(p_ref, x_ref, o_ref):
    # p_ref: SMEM f32[22]          folded conv weights & biases
    # x_ref: VMEM f32[8, 8, NB]    one lane-block of planes (batch on lanes)
    # o_ref: VMEM f32[3, 3, NB]    matching block of outputs
    x = x_ref[...]
    nb = x.shape[-1]

    # Hoist every SMEM scalar read once (JAX does not CSE scalar broadcasts).
    msd_w = [[p_ref[_MSD_W + 3 * i + j] for j in range(3)] for i in range(3)]
    msd_b = p_ref[_MSD_B]
    mfd_w = [[p_ref[_MFD_W + 3 * i + j] for j in range(3)] for i in range(3)]
    mfd_b = p_ref[_MFD_B]
    fre_w = p_ref[_FRE_W]
    fre_b = p_ref[_FRE_B]

    # ---- msd: MaxPool(3,2,1) -> folded (3x3 s2 conv + 1x1 conv) -> ReLU -----
    # Only the 3x3 block of pool positions feeding the single conv output is
    # computed; row-window maxes are full-vreg maxes, col windows are tiny.
    acc1 = jnp.zeros((1, nb), jnp.float32) + msd_b
    for i, (r0, r1) in enumerate(_POOL_WIN):
        xr = x[r0]                                        # (8, nb), full vreg
        for r in range(r0 + 1, r1):
            xr = jnp.maximum(xr, x[r])                    # row-window max
        for j, (c0, c1) in enumerate(_POOL_WIN):
            pm = xr[c0:c0 + 1, :]                         # (1, nb)
            for c in range(c0 + 1, c1):
                pm = jnp.maximum(pm, xr[c:c + 1, :])      # col-window max
            acc1 = acc1 + msd_w[i][j] * pm
    v1 = jnp.maximum(acc1, 0.0)                           # per-plane scalar

    # ---- v2 = |x - msd(x)| ---------------------------------------------------
    v2 = jnp.abs(x - v1[None, :, :])                      # (8, 8, nb)

    # ---- mfd: folded (3x3 s2 conv + 1x1 conv), blocked accumulation ----------
    # For output row i accumulate 5-column sublane slabs:
    #   acc[c] = b + sum_{di,dj} w[di,dj] * v2[2i+di, c+dj]
    # The stride-2 conv outputs for row i are acc[0], acc[2], acc[4].
    out_rows = []
    for i in range(3):
        acc = jnp.zeros((5, nb), jnp.float32) + mfd_b
        for di in range(3):
            row = v2[2 * i + di]                          # (8, nb)
            for dj in range(3):
                acc = acc + mfd_w[di][dj] * row[dj:dj + 5, :]
        out_rows.append(
            jnp.concatenate([acc[0:1, :], acc[2:3, :], acc[4:5, :]], axis=0))
    z = jnp.stack(out_rows, axis=0)                       # (3, 3, nb)

    # ---- ReLU -> fre 1x1 conv -> Sigmoid (the two torch `abs` are no-ops) ----
    v3 = jnp.maximum(z, 0.0)                              # abs(relu(.)) == relu(.)
    t = fre_w * v3 + fre_b
    o_ref[...] = 1.0 / (1.0 + jnp.exp(-t))                # abs(sigmoid) == sigmoid


def fold_params(msd_w1, msd_b1, msd_w2, msd_b2,
                mfd_w1, mfd_b1, mfd_w2, mfd_b2, fre_w, fre_b):
    """Fold each (3x3 conv -> 1x1 conv) pair into one effective 3x3 conv.

    Exact: w_eff[i,j] = sum_c w2[c]*w1[c,i,j], b_eff = b2 + sum_c w2[c]*b1[c]
    (the ReLU comes after the 1x1 + bias)."""
    def fold(w1, b1, w2, b2):
        s = w2.reshape(3, 1, 1)                           # (1,3,1,1) -> (3,1,1)
        w_eff = jnp.sum(s * w1[:, 0], axis=0)             # (3, 3)
        b_eff = b2.reshape(1) + jnp.sum(s.reshape(3) * b1).reshape(1)
        return w_eff.reshape(-1), b_eff
    mw, mb = fold(msd_w1, msd_b1, msd_w2, msd_b2)
    fw, fb = fold(mfd_w1, mfd_b1, mfd_w2, mfd_b2)
    p = jnp.concatenate([mw, mb, fw, fb, fre_w.reshape(1), fre_b.reshape(1)])
    return p.astype(jnp.float32)


def _round_up(n, m):
    return -(-n // m) * m


@jax.jit
def model_forward(x_hwb, params):
    """Fast path, lane-major: x_hwb f32[8, 8, B] -> f32[3, 3, B].

    No host-side layout ops around the pallas_call; B is padded to whole
    128-lane vregs and split into grid blocks for DMA/compute pipelining."""
    h, w, b = x_hwb.shape
    assert h == H and w == H, "kernel is specialized to 8x8 planes"
    assert params.shape == (_NPARAMS,)
    blk = 1024 if b >= 1024 else 128           # lane block per grid step
    bp = _round_up(b, blk)
    xp = x_hwb.astype(jnp.float32)
    if bp != b:
        xp = jnp.pad(xp, ((0, 0), (0, 0), (0, bp - b)))
    out = pl.pallas_call(
        _model_kernel,
        out_shape=jax.ShapeDtypeStruct((3, 3, bp), jnp.float32),
        grid=(bp // blk,),
        in_specs=[
            pl.BlockSpec(memory_space=pltpu.MemorySpace.SMEM),   # 22 scalars
            pl.BlockSpec((H, H, blk), lambda i: (0, 0, i)),      # plane block
        ],
        out_specs=pl.BlockSpec((3, 3, blk), lambda i: (0, 0, i)),
        compiler_params=pltpu.CompilerParams(
            dimension_semantics=("parallel",)),   # both TCs on v7x
    )(params.astype(jnp.float32), xp)
    return out if bp == b else out[:, :, :b]


@jax.jit
def model_forward_nchw(x_nchw, params):
    """NCHW-compatible adapter: (B, 1, 8, 8) -> (B, 1, 3, 3).

    The two transposes here are exactly the host-side layout cost the
    lane-major path avoids; prefer `model_forward` when the surrounding model
    can keep the (H, W, B) layout end to end."""
    xl = jnp.transpose(x_nchw[:, 0], (1, 2, 0))
    out = model_forward(xl, params)
    return jnp.transpose(out, (2, 0, 1))[:, None]


def reference_forward(x4d, p):
    (mw1, mb1, mw2, mb2, fw1, fb1, fw2, fb2, gw, gb) = p
    hp = lax.Precision.HIGHEST
    pooled = lax.reduce_window(x4d, -jnp.inf, lax.max, (1, 1, 3, 3),
                               (1, 1, 2, 2), ((0, 0), (0, 0), (1, 1), (1, 1)))
    c = lax.conv(pooled, mw1, (2, 2), 'VALID', precision=hp) + mb1.reshape(1, 3, 1, 1)
    c = lax.conv(c, mw2, (1, 1), 'VALID', precision=hp) + mb2.reshape(1, 1, 1, 1)
    v1 = jnp.maximum(c, 0.0)
    v2 = jnp.abs(x4d - v1)
    d = lax.conv(v2, fw1, (2, 2), 'VALID', precision=hp) + fb1.reshape(1, 3, 1, 1)
    d = lax.conv(d, fw2, (1, 1), 'VALID', precision=hp) + fb2.reshape(1, 1, 1, 1)
    v3 = jnp.abs(jnp.maximum(d, 0.0))
    f = lax.conv(v3, gw, (1, 1), 'VALID', precision=hp) + gb.reshape(1, 1, 1, 1)
    return jnp.abs(jax.nn.sigmoid(f))


if __name__ == "__main__":
    key = jax.random.PRNGKey(0)
    ks = jax.random.split(key, 11)
    BATCH = 256                     # 2 grid steps of 128 lanes each
    x = jax.random.normal(ks[0], (BATCH, 1, H, H), jnp.float32)

    msd_w1 = 0.2 * jax.random.normal(ks[1], (3, 1, 3, 3), jnp.float32)
    msd_b1 = 0.1 * jax.random.normal(ks[2], (3,), jnp.float32)
    msd_w2 = 0.2 * jax.random.normal(ks[3], (1, 3, 1, 1), jnp.float32)
    msd_b2 = 0.1 * jax.random.normal(ks[4], (1,), jnp.float32)
    mfd_w1 = 0.2 * jax.random.normal(ks[5], (3, 1, 3, 3), jnp.float32)
    mfd_b1 = 0.1 * jax.random.normal(ks[6], (3,), jnp.float32)
    mfd_w2 = 0.2 * jax.random.normal(ks[7], (1, 3, 1, 1), jnp.float32)
    mfd_b2 = 0.1 * jax.random.normal(ks[8], (1,), jnp.float32)
    fre_w = 0.2 * jax.random.normal(ks[9], (1, 1, 1, 1), jnp.float32)
    fre_b = 0.1 * jax.random.normal(ks[10], (1,), jnp.float32)

    params = fold_params(msd_w1, msd_b1, msd_w2, msd_b2,
                         mfd_w1, mfd_b1, mfd_w2, mfd_b2, fre_w, fre_b)
    assert params.shape == (_NPARAMS,)

    # Lane-major fast path.  The relayout below is test-harness only; a real
    # pipeline keeps the (H, W, B) layout end to end around the kernel.
    x_hwb = jnp.transpose(x[:, 0], (1, 2, 0))
    out_hwb = jax.block_until_ready(model_forward(x_hwb, params))
    assert out_hwb.shape == (3, 3, BATCH)

    ref = np.asarray(reference_forward(
        x, (msd_w1, msd_b1, msd_w2, msd_b2,
            mfd_w1, mfd_b1, mfd_w2, mfd_b2, fre_w, fre_b)))

    np.testing.assert_allclose(
        np.transpose(np.asarray(out_hwb), (2, 0, 1))[:, None], ref,
        rtol=1e-4, atol=1e-5)

    # NCHW-compatible adapter (keeps the torch module's layout contract).
    out_nchw = jax.block_until_ready(model_forward_nchw(x, params))
    assert out_nchw.shape == (BATCH, 1, 3, 3)
    np.testing.assert_allclose(np.asarray(out_nchw), ref, rtol=1e-4, atol=1e-5)

    print("KERNEL_OK")
</pallas_src>

<mosaic_0001>
module attributes {stable_mosaic.version = 11 : i64} {
  func.func @_model_kernel(%arg0: i32, %arg1: memref<22xf32, #tpu.memory_space<smem>>, %arg2: memref<8x8x128xf32, #tpu.memory_space<vmem>>, %arg3: memref<3x3x128xf32, #tpu.memory_space<vmem>>) attributes {dimension_semantics = [#tpu.dimension_semantics<parallel>], iteration_bounds = array<i64: 2>, scalar_prefetch = 0 : i64, scratch_operands = 0 : i64, tpu.core_type = #tpu.core_type<tc>, window_params = [{transform_indices = @transform_0, window_bounds = array<i64: 22>}, {transform_indices = @transform_1, window_bounds = array<i64: 8, 8, 128>}, {transform_indices = @transform_2, window_bounds = array<i64: 3, 3, 128>}]} {
    %c0 = arith.constant 0 : index
    %c0_0 = arith.constant 0 : index
    %c0_1 = arith.constant 0 : index
    %0 = vector.load %arg2[%c0, %c0_0, %c0_1] : memref<8x8x128xf32, #tpu.memory_space<vmem>>, vector<8x8x128xf32>
    %c0_2 = arith.constant 0 : index
    %1 = memref.load %arg1[%c0_2] : memref<22xf32, #tpu.memory_space<smem>>
    %c1 = arith.constant 1 : index
    %2 = memref.load %arg1[%c1] : memref<22xf32, #tpu.memory_space<smem>>
    %c2 = arith.constant 2 : index
    %3 = memref.load %arg1[%c2] : memref<22xf32, #tpu.memory_space<smem>>
    %c3 = arith.constant 3 : index
    %4 = memref.load %arg1[%c3] : memref<22xf32, #tpu.memory_space<smem>>
    %c4 = arith.constant 4 : index
    %5 = memref.load %arg1[%c4] : memref<22xf32, #tpu.memory_space<smem>>
    %c5 = arith.constant 5 : index
    %6 = memref.load %arg1[%c5] : memref<22xf32, #tpu.memory_space<smem>>
    %c6 = arith.constant 6 : index
    %7 = memref.load %arg1[%c6] : memref<22xf32, #tpu.memory_space<smem>>
    %c7 = arith.constant 7 : index
    %8 = memref.load %arg1[%c7] : memref<22xf32, #tpu.memory_space<smem>>
    %c8 = arith.constant 8 : index
    %9 = memref.load %arg1[%c8] : memref<22xf32, #tpu.memory_space<smem>>
    %c9 = arith.constant 9 : index
    %10 = memref.load %arg1[%c9] : memref<22xf32, #tpu.memory_space<smem>>
    %c10 = arith.constant 10 : index
    %11 = memref.load %arg1[%c10] : memref<22xf32, #tpu.memory_space<smem>>
    %c11 = arith.constant 11 : index
    %12 = memref.load %arg1[%c11] : memref<22xf32, #tpu.memory_space<smem>>
    %c12 = arith.constant 12 : index
    %13 = memref.load %arg1[%c12] : memref<22xf32, #tpu.memory_space<smem>>
    %c13 = arith.constant 13 : index
    %14 = memref.load %arg1[%c13] : memref<22xf32, #tpu.memory_space<smem>>
    %c14 = arith.constant 14 : index
    %15 = memref.load %arg1[%c14] : memref<22xf32, #tpu.memory_space<smem>>
    %c15 = arith.constant 15 : index
    %16 = memref.load %arg1[%c15] : memref<22xf32, #tpu.memory_space<smem>>
    %c16 = arith.constant 16 : index
    %17 = memref.load %arg1[%c16] : memref<22xf32, #tpu.memory_space<smem>>
    %c17 = arith.constant 17 : index
    %18 = memref.load %arg1[%c17] : memref<22xf32, #tpu.memory_space<smem>>
    %c18 = arith.constant 18 : index
    %19 = memref.load %arg1[%c18] : memref<22xf32, #tpu.memory_space<smem>>
    %c19 = arith.constant 19 : index
    %20 = memref.load %arg1[%c19] : memref<22xf32, #tpu.memory_space<smem>>
    %c20 = arith.constant 20 : index
    %21 = memref.load %arg1[%c20] : memref<22xf32, #tpu.memory_space<smem>>
    %c21 = arith.constant 21 : index
    %22 = memref.load %arg1[%c21] : memref<22xf32, #tpu.memory_space<smem>>
    %cst = arith.constant 0.000000e+00 : f32
    %23 = vector.broadcast %cst : f32 to vector<1x128xf32>
    %24 = vector.broadcast %10 : f32 to vector<1x128xf32>
    %25 = arith.addf %23, %24 : vector<1x128xf32>
    %26 = vector.extract_strided_slice %0 {offsets = [0, 0, 0], sizes = [1, 8, 128], strides = [1, 1, 1]} : vector<8x8x128xf32> to vector<1x8x128xf32>
    %27 = vector.shape_cast %26 : vector<1x8x128xf32> to vector<8x128xf32>
    %28 = vector.extract_strided_slice %0 {offsets = [1, 0, 0], sizes = [1, 8, 128], strides = [1, 1, 1]} : vector<8x8x128xf32> to vector<1x8x128xf32>
    %29 = vector.shape_cast %28 : vector<1x8x128xf32> to vector<8x128xf32>
    %30 = arith.maximumf %27, %29 : vector<8x128xf32>
    %31 = vector.extract_strided_slice %30 {offsets = [0, 0], sizes = [1, 128], strides = [1, 1]} : vector<8x128xf32> to vector<1x128xf32>
    %32 = vector.extract_strided_slice %30 {offsets = [1, 0], sizes = [1, 128], strides = [1, 1]} : vector<8x128xf32> to vector<1x128xf32>
    %33 = arith.maximumf %31, %32 : vector<1x128xf32>
    %34 = vector.broadcast %1 : f32 to vector<1x128xf32>
    %35 = arith.mulf %34, %33 : vector<1x128xf32>
    %36 = arith.addf %25, %35 : vector<1x128xf32>
    %37 = vector.extract_strided_slice %30 {offsets = [1, 0], sizes = [1, 128], strides = [1, 1]} : vector<8x128xf32> to vector<1x128xf32>
    %38 = vector.extract_strided_slice %30 {offsets = [2, 0], sizes = [1, 128], strides = [1, 1]} : vector<8x128xf32> to vector<1x128xf32>
    %39 = arith.maximumf %37, %38 : vector<1x128xf32>
    %40 = vector.extract_strided_slice %30 {offsets = [3, 0], sizes = [1, 128], strides = [1, 1]} : vector<8x128xf32> to vector<1x128xf32>
    %41 = arith.maximumf %39, %40 : vector<1x128xf32>
    %42 = vector.broadcast %2 : f32 to vector<1x128xf32>
    %43 = arith.mulf %42, %41 : vector<1x128xf32>
    %44 = arith.addf %36, %43 : vector<1x128xf32>
    %45 = vector.extract_strided_slice %30 {offsets = [3, 0], sizes = [1, 128], strides = [1, 1]} : vector<8x128xf32> to vector<1x128xf32>
    %46 = vector.extract_strided_slice %30 {offsets = [4, 0], sizes = [1, 128], strides = [1, 1]} : vector<8x128xf32> to vector<1x128xf32>
    %47 = arith.maximumf %45, %46 : vector<1x128xf32>
    %48 = vector.extract_strided_slice %30 {offsets = [5, 0], sizes = [1, 128], strides = [1, 1]} : vector<8x128xf32> to vector<1x128xf32>
    %49 = arith.maximumf %47, %48 : vector<1x128xf32>
    %50 = vector.broadcast %3 : f32 to vector<1x128xf32>
    %51 = arith.mulf %50, %49 : vector<1x128xf32>
    %52 = arith.addf %44, %51 : vector<1x128xf32>
    %53 = vector.extract_strided_slice %0 {offsets = [1, 0, 0], sizes = [1, 8, 128], strides = [1, 1, 1]} : vector<8x8x128xf32> to vector<1x8x128xf32>
    %54 = vector.shape_cast %53 : vector<1x8x128xf32> to vector<8x128xf32>
    %55 = vector.extract_strided_slice %0 {offsets = [2, 0, 0], sizes = [1, 8, 128], strides = [1, 1, 1]} : vector<8x8x128xf32> to vector<1x8x128xf32>
    %56 = vector.shape_cast %55 : vector<1x8x128xf32> to vector<8x128xf32>
    %57 = arith.maximumf %54, %56 : vector<8x128xf32>
    %58 = vector.extract_strided_slice %0 {offsets = [3, 0, 0], sizes = [1, 8, 128], strides = [1, 1, 1]} : vector<8x8x128xf32> to vector<1x8x128xf32>
    %59 = vector.shape_cast %58 : vector<1x8x128xf32> to vector<8x128xf32>
    %60 = arith.maximumf %57, %59 : vector<8x128xf32>
    %61 = vector.extract_strided_slice %60 {offsets = [0, 0], sizes = [1, 128], strides = [1, 1]} : vector<8x128xf32> to vector<1x128xf32>
    %62 = vector.extract_strided_slice %60 {offsets = [1, 0], sizes = [1, 128], strides = [1, 1]} : vector<8x128xf32> to vector<1x128xf32>
    %63 = arith.maximumf %61, %62 : vector<1x128xf32>
    %64 = vector.broadcast %4 : f32 to vector<1x128xf32>
    %65 = arith.mulf %64, %63 : vector<1x128xf32>
    %66 = arith.addf %52, %65 : vector<1x128xf32>
    %67 = vector.extract_strided_slice %60 {offsets = [1, 0], sizes = [1, 128], strides = [1, 1]} : vector<8x128xf32> to vector<1x128xf32>
    %68 = vector.extract_strided_slice %60 {offsets = [2, 0], sizes = [1, 128], strides = [1, 1]} : vector<8x128xf32> to vector<1x128xf32>
    %69 = arith.maximumf %67, %68 : vector<1x128xf32>
    %70 = vector.extract_strided_slice %60 {offsets = [3, 0], sizes = [1, 128], strides = [1, 1]} : vector<8x128xf32> to vector<1x128xf32>
    %71 = arith.maximumf %69, %70 : vector<1x128xf32>
    %72 = vector.broadcast %5 : f32 to vector<1x128xf32>
    %73 = arith.mulf %72, %71 : vector<1x128xf32>
    %74 = arith.addf %66, %73 : vector<1x128xf32>
    %75 = vector.extract_strided_slice %60 {offsets = [3, 0], sizes = [1, 128], strides = [1, 1]} : vector<8x128xf32> to vector<1x128xf32>
    %76 = vector.extract_strided_slice %60 {offsets = [4, 0], sizes = [1, 128], strides = [1, 1]} : vector<8x128xf32> to vector<1x128xf32>
    %77 = arith.maximumf %75, %76 : vector<1x128xf32>
    %78 = vector.extract_strided_slice %60 {offsets = [5, 0], sizes = [1, 128], strides = [1, 1]} : vector<8x128xf32> to vector<1x128xf32>
    %79 = arith.maximumf %77, %78 : vector<1x128xf32>
    %80 = vector.broadcast %6 : f32 to vector<1x128xf32>
    %81 = arith.mulf %80, %79 : vector<1x128xf32>
    %82 = arith.addf %74, %81 : vector<1x128xf32>
    %83 = vector.extract_strided_slice %0 {offsets = [3, 0, 0], sizes = [1, 8, 128], strides = [1, 1, 1]} : vector<8x8x128xf32> to vector<1x8x128xf32>
    %84 = vector.shape_cast %83 : vector<1x8x128xf32> to vector<8x128xf32>
    %85 = vector.extract_strided_slice %0 {offsets = [4, 0, 0], sizes = [1, 8, 128], strides = [1, 1, 1]} : vector<8x8x128xf32> to vector<1x8x128xf32>
    %86 = vector.shape_cast %85 : vector<1x8x128xf32> to vector<8x128xf32>
    %87 = arith.maximumf %84, %86 : vector<8x128xf32>
    %88 = vector.extract_strided_slice %0 {offsets = [5, 0, 0], sizes = [1, 8, 128], strides = [1, 1, 1]} : vector<8x8x128xf32> to vector<1x8x128xf32>
    %89 = vector.shape_cast %88 : vector<1x8x128xf32> to vector<8x128xf32>
    %90 = arith.maximumf %87, %89 : vector<8x128xf32>
    %91 = vector.extract_strided_slice %90 {offsets = [0, 0], sizes = [1, 128], strides = [1, 1]} : vector<8x128xf32> to vector<1x128xf32>
    %92 = vector.extract_strided_slice %90 {offsets = [1, 0], sizes = [1, 128], strides = [1, 1]} : vector<8x128xf32> to vector<1x128xf32>
    %93 = arith.maximumf %91, %92 : vector<1x128xf32>
    %94 = vector.broadcast %7 : f32 to vector<1x128xf32>
    %95 = arith.mulf %94, %93 : vector<1x128xf32>
    %96 = arith.addf %82, %95 : vector<1x128xf32>
    %97 = vector.extract_strided_slice %90 {offsets = [1, 0], sizes = [1, 128], strides = [1, 1]} : vector<8x128xf32> to vector<1x128xf32>
    %98 = vector.extract_strided_slice %90 {offsets = [2, 0], sizes = [1, 128], strides = [1, 1]} : vector<8x128xf32> to vector<1x128xf32>
    %99 = arith.maximumf %97, %98 : vector<1x128xf32>
    %100 = vector.extract_strided_slice %90 {offsets = [3, 0], sizes = [1, 128], strides = [1, 1]} : vector<8x128xf32> to vector<1x128xf32>
    %101 = arith.maximumf %99, %100 : vector<1x128xf32>
    %102 = vector.broadcast %8 : f32 to vector<1x128xf32>
    %103 = arith.mulf %102, %101 : vector<1x128xf32>
    %104 = arith.addf %96, %103 : vector<1x128xf32>
    %105 = vector.extract_strided_slice %90 {offsets = [3, 0], sizes = [1, 128], strides = [1, 1]} : vector<8x128xf32> to vector<1x128xf32>
    %106 = vector.extract_strided_slice %90 {offsets = [4, 0], sizes = [1, 128], strides = [1, 1]} : vector<8x128xf32> to vector<1x128xf32>
    %107 = arith.maximumf %105, %106 : vector<1x128xf32>
    %108 = vector.extract_strided_slice %90 {offsets = [5, 0], sizes = [1, 128], strides = [1, 1]} : vector<8x128xf32> to vector<1x128xf32>
    %109 = arith.maximumf %107, %108 : vector<1x128xf32>
    %110 = vector.broadcast %9 : f32 to vector<1x128xf32>
    %111 = arith.mulf %110, %109 : vector<1x128xf32>
    %112 = arith.addf %104, %111 : vector<1x128xf32>
    %cst_3 = arith.constant 0.000000e+00 : f32
    %113 = vector.broadcast %cst_3 : f32 to vector<1x128xf32>
    %114 = arith.maximumf %112, %113 : vector<1x128xf32>
    %115 = vector.shape_cast %114 : vector<1x128xf32> to vector<1x1x128xf32>
    %116 = vector.broadcast %115 : vector<1x1x128xf32> to vector<8x8x128xf32>
    %117 = arith.subf %0, %116 : vector<8x8x128xf32>
    %118 = math.absf %117 : vector<8x8x128xf32>
    %cst_4 = arith.constant 0.000000e+00 : f32
    %119 = vector.broadcast %cst_4 : f32 to vector<5x128xf32>
    %120 = vector.broadcast %20 : f32 to vector<5x128xf32>
    %121 = arith.addf %119, %120 : vector<5x128xf32>
    %122 = vector.extract_strided_slice %118 {offsets = [0, 0, 0], sizes = [1, 8, 128], strides = [1, 1, 1]} : vector<8x8x128xf32> to vector<1x8x128xf32>
    %123 = vector.shape_cast %122 : vector<1x8x128xf32> to vector<8x128xf32>
    %124 = vector.extract_strided_slice %123 {offsets = [0, 0], sizes = [5, 128], strides = [1, 1]} : vector<8x128xf32> to vector<5x128xf32>
    %125 = vector.broadcast %11 : f32 to vector<5x128xf32>
    %126 = arith.mulf %125, %124 : vector<5x128xf32>
    %127 = arith.addf %121, %126 : vector<5x128xf32>
    %128 = vector.extract_strided_slice %123 {offsets = [1, 0], sizes = [5, 128], strides = [1, 1]} : vector<8x128xf32> to vector<5x128xf32>
    %129 = vector.broadcast %12 : f32 to vector<5x128xf32>
    %130 = arith.mulf %129, %128 : vector<5x128xf32>
    %131 = arith.addf %127, %130 : vector<5x128xf32>
    %132 = vector.extract_strided_slice %123 {offsets = [2, 0], sizes = [5, 128], strides = [1, 1]} : vector<8x128xf32> to vector<5x128xf32>
    %133 = vector.broadcast %13 : f32 to vector<5x128xf32>
    %134 = arith.mulf %133, %132 : vector<5x128xf32>
    %135 = arith.addf %131, %134 : vector<5x128xf32>
    %136 = vector.extract_strided_slice %118 {offsets = [1, 0, 0], sizes = [1, 8, 128], strides = [1, 1, 1]} : vector<8x8x128xf32> to vector<1x8x128xf32>
    %137 = vector.shape_cast %136 : vector<1x8x128xf32> to vector<8x128xf32>
    %138 = vector.extract_strided_slice %137 {offsets = [0, 0], sizes = [5, 128], strides = [1, 1]} : vector<8x128xf32> to vector<5x128xf32>
    %139 = vector.broadcast %14 : f32 to vector<5x128xf32>
    %140 = arith.mulf %139, %138 : vector<5x128xf32>
    %141 = arith.addf %135, %140 : vector<5x128xf32>
    %142 = vector.extract_strided_slice %137 {offsets = [1, 0], sizes = [5, 128], strides = [1, 1]} : vector<8x128xf32> to vector<5x128xf32>
    %143 = vector.broadcast %15 : f32 to vector<5x128xf32>
    %144 = arith.mulf %143, %142 : vector<5x128xf32>
    %145 = arith.addf %141, %144 : vector<5x128xf32>
    %146 = vector.extract_strided_slice %137 {offsets = [2, 0], sizes = [5, 128], strides = [1, 1]} : vector<8x128xf32> to vector<5x128xf32>
    %147 = vector.broadcast %16 : f32 to vector<5x128xf32>
    %148 = arith.mulf %147, %146 : vector<5x128xf32>
    %149 = arith.addf %145, %148 : vector<5x128xf32>
    %150 = vector.extract_strided_slice %118 {offsets = [2, 0, 0], sizes = [1, 8, 128], strides = [1, 1, 1]} : vector<8x8x128xf32> to vector<1x8x128xf32>
    %151 = vector.shape_cast %150 : vector<1x8x128xf32> to vector<8x128xf32>
    %152 = vector.extract_strided_slice %151 {offsets = [0, 0], sizes = [5, 128], strides = [1, 1]} : vector<8x128xf32> to vector<5x128xf32>
    %153 = vector.broadcast %17 : f32 to vector<5x128xf32>
    %154 = arith.mulf %153, %152 : vector<5x128xf32>
    %155 = arith.addf %149, %154 : vector<5x128xf32>
    %156 = vector.extract_strided_slice %151 {offsets = [1, 0], sizes = [5, 128], strides = [1, 1]} : vector<8x128xf32> to vector<5x128xf32>
    %157 = vector.broadcast %18 : f32 to vector<5x128xf32>
    %158 = arith.mulf %157, %156 : vector<5x128xf32>
    %159 = arith.addf %155, %158 : vector<5x128xf32>
    %160 = vector.extract_strided_slice %151 {offsets = [2, 0], sizes = [5, 128], strides = [1, 1]} : vector<8x128xf32> to vector<5x128xf32>
    %161 = vector.broadcast %19 : f32 to vector<5x128xf32>
    %162 = arith.mulf %161, %160 : vector<5x128xf32>
    %163 = arith.addf %159, %162 : vector<5x128xf32>
    %164 = vector.extract_strided_slice %163 {offsets = [0, 0], sizes = [1, 128], strides = [1, 1]} : vector<5x128xf32> to vector<1x128xf32>
    %165 = vector.extract_strided_slice %163 {offsets = [2, 0], sizes = [1, 128], strides = [1, 1]} : vector<5x128xf32> to vector<1x128xf32>
    %166 = vector.extract_strided_slice %163 {offsets = [4, 0], sizes = [1, 128], strides = [1, 1]} : vector<5x128xf32> to vector<1x128xf32>
    %167 = tpu.concatenate %164, %165, %166 in 0 : vector<1x128xf32>, vector<1x128xf32>, vector<1x128xf32> -> vector<3x128xf32>
    %cst_5 = arith.constant 0.000000e+00 : f32
    %168 = vector.broadcast %cst_5 : f32 to vector<5x128xf32>
    %169 = vector.broadcast %20 : f32 to vector<5x128xf32>
    %170 = arith.addf %168, %169 : vector<5x128xf32>
    %171 = vector.extract_strided_slice %118 {offsets = [2, 0, 0], sizes = [1, 8, 128], strides = [1, 1, 1]} : vector<8x8x128xf32> to vector<1x8x128xf32>
    %172 = vector.shape_cast %171 : vector<1x8x128xf32> to vector<8x128xf32>
    %173 = vector.extract_strided_slice %172 {offsets = [0, 0], sizes = [5, 128], strides = [1, 1]} : vector<8x128xf32> to vector<5x128xf32>
    %174 = vector.broadcast %11 : f32 to vector<5x128xf32>
    %175 = arith.mulf %174, %173 : vector<5x128xf32>
    %176 = arith.addf %170, %175 : vector<5x128xf32>
    %177 = vector.extract_strided_slice %172 {offsets = [1, 0], sizes = [5, 128], strides = [1, 1]} : vector<8x128xf32> to vector<5x128xf32>
    %178 = vector.broadcast %12 : f32 to vector<5x128xf32>
    %179 = arith.mulf %178, %177 : vector<5x128xf32>
    %180 = arith.addf %176, %179 : vector<5x128xf32>
    %181 = vector.extract_strided_slice %172 {offsets = [2, 0], sizes = [5, 128], strides = [1, 1]} : vector<8x128xf32> to vector<5x128xf32>
    %182 = vector.broadcast %13 : f32 to vector<5x128xf32>
    %183 = arith.mulf %182, %181 : vector<5x128xf32>
    %184 = arith.addf %180, %183 : vector<5x128xf32>
    %185 = vector.extract_strided_slice %118 {offsets = [3, 0, 0], sizes = [1, 8, 128], strides = [1, 1, 1]} : vector<8x8x128xf32> to vector<1x8x128xf32>
    %186 = vector.shape_cast %185 : vector<1x8x128xf32> to vector<8x128xf32>
    %187 = vector.extract_strided_slice %186 {offsets = [0, 0], sizes = [5, 128], strides = [1, 1]} : vector<8x128xf32> to vector<5x128xf32>
    %188 = vector.broadcast %14 : f32 to vector<5x128xf32>
    %189 = arith.mulf %188, %187 : vector<5x128xf32>
    %190 = arith.addf %184, %189 : vector<5x128xf32>
    %191 = vector.extract_strided_slice %186 {offsets = [1, 0], sizes = [5, 128], strides = [1, 1]} : vector<8x128xf32> to vector<5x128xf32>
    %192 = vector.broadcast %15 : f32 to vector<5x128xf32>
    %193 = arith.mulf %192, %191 : vector<5x128xf32>
    %194 = arith.addf %190, %193 : vector<5x128xf32>
    %195 = vector.extract_strided_slice %186 {offsets = [2, 0], sizes = [5, 128], strides = [1, 1]} : vector<8x128xf32> to vector<5x128xf32>
    %196 = vector.broadcast %16 : f32 to vector<5x128xf32>
    %197 = arith.mulf %196, %195 : vector<5x128xf32>
    %198 = arith.addf %194, %197 : vector<5x128xf32>
    %199 = vector.extract_strided_slice %118 {offsets = [4, 0, 0], sizes = [1, 8, 128], strides = [1, 1, 1]} : vector<8x8x128xf32> to vector<1x8x128xf32>
    %200 = vector.shape_cast %199 : vector<1x8x128xf32> to vector<8x128xf32>
    %201 = vector.extract_strided_slice %200 {offsets = [0, 0], sizes = [5, 128], strides = [1, 1]} : vector<8x128xf32> to vector<5x128xf32>
    %202 = vector.broadcast %17 : f32 to vector<5x128xf32>
    %203 = arith.mulf %202, %201 : vector<5x128xf32>
    %204 = arith.addf %198, %203 : vector<5x128xf32>
    %205 = vector.extract_strided_slice %200 {offsets = [1, 0], sizes = [5, 128], strides = [1, 1]} : vector<8x128xf32> to vector<5x128xf32>
    %206 = vector.broadcast %18 : f32 to vector<5x128xf32>
    %207 = arith.mulf %206, %205 : vector<5x128xf32>
    %208 = arith.addf %204, %207 : vector<5x128xf32>
    %209 = vector.extract_strided_slice %200 {offsets = [2, 0], sizes = [5, 128], strides = [1, 1]} : vector<8x128xf32> to vector<5x128xf32>
    %210 = vector.broadcast %19 : f32 to vector<5x128xf32>
    %211 = arith.mulf %210, %209 : vector<5x128xf32>
    %212 = arith.addf %208, %211 : vector<5x128xf32>
    %213 = vector.extract_strided_slice %212 {offsets = [0, 0], sizes = [1, 128], strides = [1, 1]} : vector<5x128xf32> to vector<1x128xf32>
    %214 = vector.extract_strided_slice %212 {offsets = [2, 0], sizes = [1, 128], strides = [1, 1]} : vector<5x128xf32> to vector<1x128xf32>
    %215 = vector.extract_strided_slice %212 {offsets = [4, 0], sizes = [1, 128], strides = [1, 1]} : vector<5x128xf32> to vector<1x128xf32>
    %216 = tpu.concatenate %213, %214, %215 in 0 : vector<1x128xf32>, vector<1x128xf32>, vector<1x128xf32> -> vector<3x128xf32>
    %cst_6 = arith.constant 0.000000e+00 : f32
    %217 = vector.broadcast %cst_6 : f32 to vector<5x128xf32>
    %218 = vector.broadcast %20 : f32 to vector<5x128xf32>
    %219 = arith.addf %217, %218 : vector<5x128xf32>
    %220 = vector.extract_strided_slice %118 {offsets = [4, 0, 0], sizes = [1, 8, 128], strides = [1, 1, 1]} : vector<8x8x128xf32> to vector<1x8x128xf32>
    %221 = vector.shape_cast %220 : vector<1x8x128xf32> to vector<8x128xf32>
    %222 = vector.extract_strided_slice %221 {offsets = [0, 0], sizes = [5, 128], strides = [1, 1]} : vector<8x128xf32> to vector<5x128xf32>
    %223 = vector.broadcast %11 : f32 to vector<5x128xf32>
    %224 = arith.mulf %223, %222 : vector<5x128xf32>
    %225 = arith.addf %219, %224 : vector<5x128xf32>
    %226 = vector.extract_strided_slice %221 {offsets = [1, 0], sizes = [5, 128], strides = [1, 1]} : vector<8x128xf32> to vector<5x128xf32>
    %227 = vector.broadcast %12 : f32 to vector<5x128xf32>
    %228 = arith.mulf %227, %226 : vector<5x128xf32>
    %229 = arith.addf %225, %228 : vector<5x128xf32>
    %230 = vector.extract_strided_slice %221 {offsets = [2, 0], sizes = [5, 128], strides = [1, 1]} : vector<8x128xf32> to vector<5x128xf32>
    %231 = vector.broadcast %13 : f32 to vector<5x128xf32>
    %232 = arith.mulf %231, %230 : vector<5x128xf32>
    %233 = arith.addf %229, %232 : vector<5x128xf32>
    %234 = vector.extract_strided_slice %118 {offsets = [5, 0, 0], sizes = [1, 8, 128], strides = [1, 1, 1]} : vector<8x8x128xf32> to vector<1x8x128xf32>
    %235 = vector.shape_cast %234 : vector<1x8x128xf32> to vector<8x128xf32>
    %236 = vector.extract_strided_slice %235 {offsets = [0, 0], sizes = [5, 128], strides = [1, 1]} : vector<8x128xf32> to vector<5x128xf32>
    %237 = vector.broadcast %14 : f32 to vector<5x128xf32>
    %238 = arith.mulf %237, %236 : vector<5x128xf32>
    %239 = arith.addf %233, %238 : vector<5x128xf32>
    %240 = vector.extract_strided_slice %235 {offsets = [1, 0], sizes = [5, 128], strides = [1, 1]} : vector<8x128xf32> to vector<5x128xf32>
    %241 = vector.broadcast %15 : f32 to vector<5x128xf32>
    %242 = arith.mulf %241, %240 : vector<5x128xf32>
    %243 = arith.addf %239, %242 : vector<5x128xf32>
    %244 = vector.extract_strided_slice %235 {offsets = [2, 0], sizes = [5, 128], strides = [1, 1]} : vector<8x128xf32> to vector<5x128xf32>
    %245 = vector.broadcast %16 : f32 to vector<5x128xf32>
    %246 = arith.mulf %245, %244 : vector<5x128xf32>
    %247 = arith.addf %243, %246 : vector<5x128xf32>
    %248 = vector.extract_strided_slice %118 {offsets = [6, 0, 0], sizes = [1, 8, 128], strides = [1, 1, 1]} : vector<8x8x128xf32> to vector<1x8x128xf32>
    %249 = vector.shape_cast %248 : vector<1x8x128xf32> to vector<8x128xf32>
    %250 = vector.extract_strided_slice %249 {offsets = [0, 0], sizes = [5, 128], strides = [1, 1]} : vector<8x128xf32> to vector<5x128xf32>
    %251 = vector.broadcast %17 : f32 to vector<5x128xf32>
    %252 = arith.mulf %251, %250 : vector<5x128xf32>
    %253 = arith.addf %247, %252 : vector<5x128xf32>
    %254 = vector.extract_strided_slice %249 {offsets = [1, 0], sizes = [5, 128], strides = [1, 1]} : vector<8x128xf32> to vector<5x128xf32>
    %255 = vector.broadcast %18 : f32 to vector<5x128xf32>
    %256 = arith.mulf %255, %254 : vector<5x128xf32>
    %257 = arith.addf %253, %256 : vector<5x128xf32>
    %258 = vector.extract_strided_slice %249 {offsets = [2, 0], sizes = [5, 128], strides = [1, 1]} : vector<8x128xf32> to vector<5x128xf32>
    %259 = vector.broadcast %19 : f32 to vector<5x128xf32>
    %260 = arith.mulf %259, %258 : vector<5x128xf32>
    %261 = arith.addf %257, %260 : vector<5x128xf32>
    %262 = vector.extract_strided_slice %261 {offsets = [0, 0], sizes = [1, 128], strides = [1, 1]} : vector<5x128xf32> to vector<1x128xf32>
    %263 = vector.extract_strided_slice %261 {offsets = [2, 0], sizes = [1, 128], strides = [1, 1]} : vector<5x128xf32> to vector<1x128xf32>
    %264 = vector.extract_strided_slice %261 {offsets = [4, 0], sizes = [1, 128], strides = [1, 1]} : vector<5x128xf32> to vector<1x128xf32>
    %265 = tpu.concatenate %262, %263, %264 in 0 : vector<1x128xf32>, vector<1x128xf32>, vector<1x128xf32> -> vector<3x128xf32>
    %266 = vector.shape_cast %167 : vector<3x128xf32> to vector<1x3x128xf32>
    %267 = vector.shape_cast %216 : vector<3x128xf32> to vector<1x3x128xf32>
    %268 = vector.shape_cast %265 : vector<3x128xf32> to vector<1x3x128xf32>
    %269 = tpu.concatenate %266, %267, %268 in 0 : vector<1x3x128xf32>, vector<1x3x128xf32>, vector<1x3x128xf32> -> vector<3x3x128xf32>
    %cst_7 = arith.constant 0.000000e+00 : f32
    %270 = vector.broadcast %cst_7 : f32 to vector<3x3x128xf32>
    %271 = arith.maximumf %269, %270 : vector<3x3x128xf32>
    %272 = vector.broadcast %21 : f32 to vector<3x3x128xf32>
    %273 = arith.mulf %272, %271 : vector<3x3x128xf32>
    %274 = vector.broadcast %22 : f32 to vector<3x3x128xf32>
    %275 = arith.addf %273, %274 : vector<3x3x128xf32>
    %cst_8 = arith.constant 0.000000e+00 : f32
    %276 = vector.broadcast %cst_8 : f32 to vector<3x3x128xf32>
    %277 = arith.subf %276, %275 : vector<3x3x128xf32>
    %278 = math.exp %277 : vector<3x3x128xf32>
    %cst_9 = arith.constant 1.000000e+00 : f32
    %279 = vector.broadcast %cst_9 : f32 to vector<3x3x128xf32>
    %280 = arith.addf %279, %278 : vector<3x3x128xf32>
    %cst_10 = arith.constant 1.000000e+00 : f32
    %281 = vector.broadcast %cst_10 : f32 to vector<3x3x128xf32>
    %282 = arith.divf %281, %280 : vector<3x3x128xf32>
    %c0_11 = arith.constant 0 : index
    %c0_12 = arith.constant 0 : index
    %c0_13 = arith.constant 0 : index
    %283 = vector.load %arg3[%c0_11, %c0_12, %c0_13] : memref<3x3x128xf32, #tpu.memory_space<vmem>>, vector<3x3x128xf32>
    tpu.vector_store %arg3[%c0_11, %c0_12, %c0_13], %282 {strides = array<i32>} : memref<3x3x128xf32, #tpu.memory_space<vmem>>, vector<3x3x128xf32>,
    return
  }
  func.func @transform_0(%arg0: i32) -> i32 {
    %c0_i32 = arith.constant 0 : i32
    %c0_i32_0 = arith.constant 0 : i32
    return %c0_i32 : i32
  }
  func.func @transform_1(%arg0: i32) -> (i32, i32, i32) {
    %c0_i32 = arith.constant 0 : i32
    %c0_i32_0 = arith.constant 0 : i32
    %c0_i32_1 = arith.constant 0 : i32
    return %c0_i32, %c0_i32_0, %arg0 : i32, i32, i32
  }
  func.func @transform_2(%arg0: i32) -> (i32, i32, i32) {
    %c0_i32 = arith.constant 0 : i32
    %c0_i32_0 = arith.constant 0 : i32
    %c0_i32_1 = arith.constant 0 : i32
    return %c0_i32, %c0_i32_0, %arg0 : i32, i32, i32
  }
}

</mosaic_0001>

<bundles_post_ra>
// kernel: model_forward.1
= control target key start
LH: loop header
LB: loop body
LE: loop exit
PB: predicated region body
PF: predicated region fallthrough
CT: control target
= control target key end

     0   :  { %7 = vsyncpa [#allocation5], 0  ;;  %s1061_s0 = inlined_call_operand.vmem [shape: f32[22], index: 0, kind: input, shape index: {}]   ;;  %s1062_s1 = inlined_call_operand.hbm [shape: f32[8,8,256], index: 1, kind: input, shape index: {}]   ;;  %s1063_s2 = inlined_call_operand.hbm [shape: f32[3,3,256], index: 2, kind: output, shape index: {}]  }
   0x1   :  { %8 = vsyncpa [#allocation3], 0 }
   0x2   :  { %10 = vsyncpa [#allocation3 + $0x1], 0 }
   0x3   :  { %11 = vsyncpa [#allocation4], 0 }
   0x4   :  { %13 = vsyncpa [#allocation4 + $0x1], 0  ;;  %s814_s9 = smov 0   ;;  %s816_s10 = smov 0  }
   0x5   :  { %s818_s11 = smov 0   ;;  %s820_s12 = smov 0  }
   0x6 LB: > { %s835_s13 = sadd.s32 4294967295, %s788_s12   ;;  %s568_s14 = sadd.s32 4294967294, %s788_s12   ;;  %s788_s12 = sphi %s820_s12, %s1085_s12   ;;  %s784_s11 = sphi %s818_s11, %s1084_s11   ;;  %s780_s10 = sphi %s816_s10, %s1083_s10   ;;  %s776_s9 = sphi %s814_s9, %s1082_s9  }
   0x7   : > { %s839_s15 = sadd.s32 1, %s788_s12   ;;  %s47_s16 = sadd.s32 1, %s784_s11 }
   0x8   : > { %s44_s17 = ssub.s32 %s788_s12, %s839_s15  ;;  %p54_p0 = scmp.ne.s32.totalorder %s784_s11, %s780_s10 }
   0x9   : > { %p45_p1 = scmp.eq.s32.totalorder %s44_s17, 0  ;;  %p55_p2 = scmp.eq.s32.totalorder %s788_s12, 0 }
   0xa   : > { %p60_p3 = scmp.ne.s32.totalorder %s780_s10, %s776_s9  ;;  %p1065_p4 = scmp.eq.s32.totalorder %s835_s13, 0 }
   0xb   : > { %s851_s18 = scalar_select %p45_p1, %s784_s11, %s47_s16  }
   0xc   : > { %p853_p5 = por %p55_p2, %p54_p0  ;;  %p859_p6 = por %p1065_p4, %p60_p3 }
   0xd   : > { %p84_p7 = scmp.eq.s32.totalorder %s835_s13, 1  ;;  %p90_p8 = scmp.eq.s32.totalorder %s568_s14, 1 }
   0xe   : > { %s1069_s20 = scalar_select %p859_p6, 1, 0 }
   0xf   : > { %p569_p9 = scmp.ge.s32.totalorder %s788_s12, 1  ;;  %p97_p10 = scmp.lt.s32.totalorder %s788_s12, 3 }
  0x10   : > { %p866_p11 = por %p84_p7, %p54_p0  ;;  %p870_p12 = por %p90_p8, %p60_p3 }
  0x11   : > { %p874_p13 = pnand %p569_p9, %p97_p10  ;;  %s110_s26 = sshll.u32 %s1061_s0, 4  ;;  %s111_s26 = int_to_ptr.vmem [resolvable:$true] %s110_s26 }
  0x12   : > { %s1070_s21 = scalar_select %p866_p11, 1, 0 }
  0x13   : > { %s1071_s22 = scalar_select %p870_p12, 1, 0 }
  0x14   : > { %s1072_s23 = scalar_select %p874_p13, 1, 0 }
  0x15   : > { %p610_p1 = pneg %p874_p13  ;;  %p623_p2 = scmp.lt.s32.totalorder %s788_s12, 2 }
  0x16   : > { %s121_s28 = sand.u32 1, %s784_s11   ;;  %s677_s3 = scalar_lea.vmem %s111_s26, 16 }
  0x17   : > { %p887_p7 = pnand %p610_p1, %p1065_p4  ;;  %p894_p3 = pnand %p623_p2, %p853_p5 }
  0x18   : > { %s572_s30 = sshll.u32 %s121_s28, 6  ;;  %p678_p8 = scmp.ne.s32.totalorder %s111_s26, %s677_s3 }
  0x19   : > { %p679_p9 = pneg %p887_p7  ;;  %p685_p12 = scmp.lt.s32.totalorder %s111_s26, %s111_s26 }
  0x1a   : > { %p686_p11 = scmp.lt.s32.totalorder %s677_s3, %s677_s3 }
  0x1b   : > { %p680_p10 = pnand %p679_p9, %p678_p8 }
  0x1c   : > { %p687_p1 = por %p686_p11, %p685_p12 }
  0x1d   : > { %p681_p0 = pneg %p680_p10 }
  0x1f   : > { %p688_p4 = pnand %p687_p1, %p681_p0 }
  0x21   : > { %691 = shalt.err (!%p688_p4)
}
  0x22   : > { %s790_s4 = smov [#allocation2]   ;;  %s573_s5 = sshll.u32 %s788_s12, 7 }
  0x23   : > { %613 = dma.vmem_to_smem (!%p887_p7), %s111_s26, 16, %s790_s4, [#allocation5]  }
  0x24   : > { %s125_s6 = scalar_lea.vmem [#allocation6], %s572_s30  ;;  %s906_s16 = scalar_lea.hbm %s1062_s1, %s573_s5 }
  0x25   : > { %s131_s7 = sshll.u32 %s125_s6, 4  ;;  %s910_s17 = scalar_lea.sflag [#allocation3], %s121_s28  ;;  %s908_s7 = int_to_ptr.vmem [resolvable:$true] %s131_s7 }
  0x26   : > { %s692_s19 = scalar_lea.hbm %s906_s16, 1024  ;;  %p694_p5 = pneg %p894_p3 }
  0x27   : > { %p693_p4 = scmp.ne.s32.totalorder %s906_s16, %s692_s19  ;;  %s697_s26 = scalar_lea.hbm %s1062_s1, 2048 }
  0x28   : > { %p698_p0 = scmp.lt.s32.totalorder %s906_s16, %s1062_s1  ;;  %p699_p2 = scmp.lt.s32.totalorder %s697_s26, %s692_s19 }
  0x29   : > { %p695_p11 = pnand %p694_p5, %p693_p4 }
  0x2a   : > { %p700_p7 = por %p699_p2, %p698_p0 }
  0x2b   : > { %p696_p12 = pneg %p695_p11 }
  0x2d   : > { %p701_p8 = pnand %p700_p7, %p696_p12 }
  0x2f   : > { %704 = shalt.err (!%p701_p8)
}
  0x30   : > { %s705_s28 = scalar_lea.vmem %s908_s7, 1024  ;;  %s791_s3 = smov [#allocation6]  }
  0x31   : > { %p706_p9 = scmp.ne.s32.totalorder %s908_s7, %s705_s28  ;;  %s710_s4 = sshll.u32 %s791_s3, 4  ;;  %s711_s4 = int_to_ptr.vmem [resolvable:$false] %s710_s4 }
  0x32   : > { %s712_s5 = scalar_lea.vmem %s711_s4, 2048  ;;  %p713_p4 = scmp.lt.s32.totalorder %s908_s7, %s711_s4 }
  0x33   : > { %p708_p10 = pnand %p706_p9, %p694_p5  ;;  %p714_p11 = scmp.lt.s32.totalorder %s712_s5, %s705_s28 }
  0x35   : > { %p709_p1 = pneg %p708_p10  ;;  %p715_p6 = por %p714_p11, %p713_p4 }
  0x37   : > { %p716_p13 = pnand %p715_p6, %p709_p1 }
  0x39   : > { %719 = shalt.err (!%p716_p13)
}
  0x3a   : > { %s792_s6 = smov 256   ;;  %s793_s8 = smov 128  }
  0x3b   : > { %s794_s14 = smov 8   ;;  %p1075_p5 = scmp.ne.s32.totalorder %s1072_s23, 0 }
  0x3c   : > { %617 = dma.hbm_to_vmem [thread:$0]  (!%p894_p3), %s906_s16, 1024, %s908_s7, %s910_s17, %s792_s6, %s793_s8, %s794_s14  }
  0x3d   : > { %143 = sbr.rel (%p1075_p5) target bundleno = 198 (0xc6), region = 28  ;;  %p1076_p12 = scmp.eq.s32.totalorder (!%p1075_p5), %s835_s13, 0 }
  0x42   : > { %763 = dma.done.wait (%p1076_p12), [#allocation5], 16   ;;  %p1077_p0 = pmov %p1076_p12 }
  0x43   : > { %s938_s19 = sand.u32 1, %s780_s10   ;;  %p1078_p6 = scmp.ne.s32.totalorder %s1069_s20, 0 }
  0x44   : > { %765 = vsyncadd (%p1077_p0), [#allocation5], 4294967280  ;;  %s576_s24 = sshll.u32 %s938_s19, 6  ;;  %s150_s25 = scalar_lea.sflag [#allocation3], %s938_s19 }
  0x45   : > { %s942_s26 = scalar_lea.vmem [#allocation6], %s576_s24 }
  0x46   : > { %767 = dma.done.wait (%p1078_p6), %s150_s25, 1024  }
  0x47   : > { %769 = vsyncadd (%p1078_p6), %s150_s25, 4294966272 }
  0x48   : > { %158 = sfence }
  0x49   : > { %v949_v0 = vld [vmem:[%s942_s26] sm:$0xff]  ;;  %v952_v1 = vld [vmem:[%s942_s26 + $0x8] sm:$0xff]  ;;  %v955_v2 = vld [vmem:[%s942_s26 + $0x10] sm:$0xff]  ;;  %s182_s23 = sld [smem:[#allocation2]]  ;;  %v278_v51 = vlaneseq  ;;  %vm348_vm0 = vcmask 1040384   ;;  %vm350_vm1 = vcmask 1041408  }
  0x4a   : > { %v958_v3 = vld [vmem:[%s942_s26 + $0x18] sm:$0xff]  ;;  %v961_v4 = vld [vmem:[%s942_s26 + $0x20] sm:$0xff]  ;;  %s577_s20 = sld [smem:[#allocation2 + $0x1]]  ;;  %v206_v5 = vmax.f32 %v949_v0, %v952_v1  ;;  %v229_v6 = vmax.f32 %v952_v1, %v955_v2  ;;  %v970_v8 = vld [vmem:[%s942_s26 + $0x28] sm:$0xff]  ;;  %p1079_p3 = scmp.ne.s32.totalorder %s1070_s21, 0 }
  0x4b   : > { %s578_s29 = sld [smem:[#allocation2 + $0x2]]  ;;  %v253_v7 = vmax.f32 %v958_v3, %v961_v4  ;;  %v279_v56 = vshrl.u32 %v278_v51, 7 }
  0x4c   : > { %v208_v9 = vrot.slane %v206_v5, 1  ;;  %v214_v10 = vrot.slane %v206_v5, 2  ;;  %v230_v11 = vmax.f32 %v229_v6, %v958_v3  ;;  %s580_s7 = sld [smem:[#allocation2 + $0x4]] }
  0x4d   : > { %s579_s16 = sld [smem:[#allocation2 + $0x3]]  ;;  %v254_v14 = vmax.f32 %v253_v7, %v970_v8  ;;  %v280_v59 = vsub.s32 0, %v279_v56 }
  0x4e   : > { %v210_v12 = vmax.f32 %v206_v5, %v208_v9  ;;  %v232_v13 = vrot.slane %v230_v11, 1  ;;  %s581_s17 = sld [smem:[#allocation2 + $0x5]]  ;;  %v238_v18 = vrot.slane %v230_v11, 2 }
  0x4f   : > { %s585_s27 = sld [smem:[#allocation2 + $0x9]]  ;;  %v211_v19 = vstv %s182_s23  ;;  %v256_v22 = vrot.slane %v254_v14, 1  ;;  %v262_v29 = vrot.slane %v254_v14, 2 }
  0x50   : > { %v216_v15 = vmax.f32 %v210_v12, %v214_v10  ;;  %v217_v16 = vstv %s577_s20  ;;  %v234_v17 = vmax.f32 %v230_v11, %v232_v13  ;;  %s583_s30 = sld [smem:[#allocation2 + $0x7]]  ;;  %v212_v23 = vmul.f32 %v211_v19, %v210_v12 }
  0x51   : > { %v223_v20 = vstv %s578_s29  ;;  %s582_s28 = sld [smem:[#allocation2 + $0x6]]  ;;  %v258_v28 = vmax.f32 %v254_v14, %v256_v22 }
  0x52   : > { %v218_v21 = vmul.f32 %v217_v16, %v216_v15  ;;  %v224_v24 = vmul.f32 %v223_v20, %v216_v15  ;;  %v240_v25 = vmax.f32 %v234_v17, %v238_v18  ;;  %s584_s3 = sld [smem:[#allocation2 + $0x8]]  ;;  %v241_v26 = vstv %s580_s7 }
  0x53   : > { %v235_v31 = vstv %s579_s16  ;;  %v264_v39 = vmax.f32 %v258_v28, %v262_v29  ;;  %s586_s4 = sld [smem:[#allocation2 + $0xa]]  ;;  %s601_s16 = smul.u32 12, %s938_s19 }
  0x54   : > { %v220_v27 = vrot.slane %v218_v21, 1  ;;  %v247_v32 = vstv %s581_s17  ;;  %v226_v34 = vrot.slane %v224_v24, 3  ;;  %v242_v35 = vmul.f32 %v241_v26, %v240_v25  ;;  %s587_s5 = sld [smem:[#allocation2 + $0xb]]  ;;  %v181_v26 = vld [vmem:[%s942_s26 + $0x30] sm:$0xff] }
  0x55   : > { %v204_v30 = vstv %s585_s27  ;;  %v236_v37 = vmul.f32 %v235_v31, %v234_v17  ;;  %v248_v38 = vmul.f32 %v247_v32, %v240_v25  ;;  %s588_s6 = sld [smem:[#allocation2 + $0xc]]  ;;  %s174_s17 = scalar_lea.vmem [#allocation7], %s601_s16 }
  0x56   : > { %v213_v33 = vadd.f32 %v212_v23, %v204_v30  ;;  %v265_v40 = vstv %s583_s30  ;;  %v244_v42 = vrot.slane %v242_v35, 1  ;;  %s589_s8 = sld [smem:[#allocation2 + $0xd]]  ;;  %s483_s27 = sshll.u32 %s174_s17, 4  ;;  %s1013_s27 = int_to_ptr.vmem [resolvable:$true] %s483_s27 }
  0x57   : > { %v259_v43 = vstv %s582_s28  ;;  %v250_v46 = vrot.slane %v248_v38, 3  ;;  %v266_v47 = vmul.f32 %v265_v40, %v264_v39  ;;  %s590_s14 = sld [smem:[#allocation2 + $0xe]]  ;;  %s598_s30 = sshll.u32 %s835_s13, 6 }
  0x58   : > { %v222_v36 = vadd.f32 %v220_v27, %v213_v33  ;;  %v271_v44 = vstv %s584_s3  ;;  %v260_v49 = vmul.f32 %v259_v43, %v258_v28  ;;  %s591_s24 = sld [smem:[#allocation2 + $0xf]]  ;;  %s795_s13 = smov [#allocation7]  }
  0x59   : > { %v272_v50 = vmul.f32 %v271_v44, %v264_v39  ;;  %v268_v53 = vrot.slane %v266_v47, 1  ;;  %s592_s25 = sld [smem:[#allocation2 + $0x10]]  ;;  %v298_v6 = vstv %s586_s4  ;;  %s1018_s4 = scalar_lea.hbm %s1063_s2, %s598_s30 }
  0x5a   : > { %v228_v41 = vadd.f32 %v226_v34, %v222_v36  ;;  %s595_s23 = sld [smem:[#allocation2 + $0x13]]  ;;  %v301_v7 = vstv %s587_s5  ;;  %s471_s5 = scalar_lea.sflag [#allocation4], %s938_s19 }
  0x5b   : > { %v274_v55 = vrot.slane %v272_v50, 3  ;;  %s593_s20 = sld [smem:[#allocation2 + $0x11]]  ;;  %v307_v9 = vstv %s588_s6  ;;  %s720_s6 = scalar_lea.vmem %s1013_s27, 192 }
  0x5c   : > { %v237_v45 = vadd.f32 %v236_v37, %v228_v41  ;;  %s594_s29 = sld [smem:[#allocation2 + $0x12]]  ;;  %v313_v16 = vstv %s589_s8  ;;  %p721_p13 = scmp.ne.s32.totalorder %s1013_s27, %s720_s6 }
  0x5d   : > { %v316_v12 = vstv %s590_s14  ;;  %s596_s26 = sld [smem:[#allocation2 + $0x14]]  ;;  %s724_s8 = sshll.u32 %s795_s13, 4  ;;  %s725_s8 = int_to_ptr.vmem [resolvable:$false] %s724_s8 }
  0x5e   : > { %v246_v48 = vadd.f32 %v244_v42, %v237_v45  ;;  %s597_s7 = sld [smem:[#allocation2 + $0x15]]  ;;  %p722_p2 = pnand %p721_p13, %p1079_p3 }
  0x5f   : > { %v986_v20 = vstv %s592_s25  ;;  %s726_s14 = scalar_lea.vmem %s725_s8, 384  ;;  %p727_p8 = scmp.lt.s32.totalorder %s1013_s27, %s725_s8 }
  0x60   : > { %v252_v52 = vadd.f32 %v250_v46, %v246_v48  ;;  %v296_v15 = vstv %s595_s23  ;;  %p723_p7 = pneg %p722_p2  ;;  %p728_p9 = scmp.lt.s32.totalorder %s726_s14, %s720_s6 }
  0x61   : > { %v988_v21 = vstv %s593_s20 }
  0x62   : > { %v261_v54 = vadd.f32 %v260_v49, %v252_v52  ;;  %v990_v22 = vstv %s594_s29  ;;  %p729_p10 = por %p728_p9, %p727_p8 }
  0x64   : > { %v270_v57 = vadd.f32 %v268_v53, %v261_v54  ;;  %p730_p1 = pnand %p729_p10, %p723_p7 }
  0x66   : > { %v276_v58 = vadd.f32 %v274_v55, %v270_v57 }
  0x68   : > { %v277_v60 = vmax.f32 %v276_v58, 0.0 }
  0x6a   : > { %v974_v61 = vrot.slane %v277_v60, %v280_v59 }
  0x6c   : > { %v282_v62 = vsub.f32 %v949_v0, %v974_v61  ;;  %v283_v63 = vsub.f32 %v952_v1, %v974_v61  ;;  %v284_v5 = vsub.f32 %v955_v2, %v974_v61  ;;  %v285_v13 = vsub.f32 %v958_v3, %v974_v61 }
  0x6d   : > { %v286_v0 = vsub.f32 %v961_v4, %v974_v61  ;;  %v322_v2 = vstv %s591_s24  ;;  %v287_v4 = vsub.f32 %v970_v8, %v974_v61  ;;  %v288_v37 = vsub.f32 %v181_v26, %v974_v61 }
  0x6e   : > { %v289_v10 = vand.u32 2147483647, %v282_v62  ;;  %v290_v11 = vand.u32 2147483647, %v283_v63  ;;  %v291_v14 = vand.u32 2147483647, %v284_v5 }
  0x6f   : > { %v292_v25 = vand.u32 2147483647, %v285_v13  ;;  %v293_v28 = vand.u32 2147483647, %v286_v0  ;;  %v294_v45 = vand.u32 2147483647, %v287_v4 }
  0x70   : > { %v299_v1 = vmul.f32 %v298_v6, %v289_v10  ;;  %v302_v17 = vmul.f32 %v301_v7, %v289_v10  ;;  %v308_v18 = vmul.f32 %v307_v9, %v289_v10  ;;  %v317_v19 = vmul.f32 %v316_v12, %v290_v11 }
  0x71   : > { %v323_v27 = vmul.f32 %v322_v2, %v290_v11  ;;  %v352_v29 = vmul.f32 %v298_v6, %v291_v14  ;;  %v314_v31 = vmul.f32 %v313_v16, %v290_v11  ;;  %v354_v32 = vmul.f32 %v301_v7, %v291_v14 }
  0x72   : > { %v300_v23 = vadd.f32 %v299_v1, %v296_v15  ;;  %v304_v3 = vrot.slane %v302_v17, 1  ;;  %v310_v24 = vrot.slane %v308_v18, 2  ;;  %v359_v33 = vmul.f32 %v307_v9, %v291_v14 }
  0x73   : > { %v319_v34 = vrot.slane %v317_v19, 1  ;;  %v332_v35 = vmul.f32 %v988_v21, %v291_v14  ;;  %v353_v36 = vadd.f32 %v352_v29, %v296_v15  ;;  %v356_v39 = vrot.slane %v354_v32, 1 }
  0x74   : > { %v306_v30 = vadd.f32 %v304_v3, %v300_v23  ;;  %v361_v40 = vrot.slane %v359_v33, 2  ;;  %v366_v41 = vmul.f32 %v316_v12, %v292_v25  ;;  %v325_v42 = vrot.slane %v323_v27, 2 }
  0x75   : > { %v338_v43 = vmul.f32 %v990_v22, %v291_v14  ;;  %v364_v44 = vmul.f32 %v313_v16, %v292_v25  ;;  %v358_v46 = vadd.f32 %v356_v39, %v353_v36  ;;  %v371_v47 = vmul.f32 %v322_v2, %v292_v25 }
  0x76   : > { %v312_v38 = vadd.f32 %v310_v24, %v306_v30  ;;  %v395_v48 = vmul.f32 %v298_v6, %v293_v28  ;;  %v329_v49 = vmul.f32 %v986_v20, %v291_v14  ;;  %v334_v50 = vrot.slane %v332_v35, 1 }
  0x77   : > { %v397_v51 = vmul.f32 %v301_v7, %v293_v28  ;;  %v402_v52 = vmul.f32 %v307_v9, %v293_v28  ;;  %v363_v54 = vadd.f32 %v361_v40, %v358_v46  ;;  %v368_v55 = vrot.slane %v366_v41, 1 }
  0x78   : > { %v315_v8 = vadd.f32 %v314_v31, %v312_v38  ;;  %v396_v56 = vadd.f32 %v395_v48, %v296_v15  ;;  %v340_v57 = vrot.slane %v338_v43, 2  ;;  %v409_v60 = vmul.f32 %v316_v12, %v294_v45 }
  0x79   : > { %v399_v58 = vrot.slane %v397_v51, 1  ;;  %v404_v59 = vrot.slane %v402_v52, 2  ;;  %v365_v62 = vadd.f32 %v364_v44, %v363_v54  ;;  %v373_v63 = vrot.slane %v371_v47, 2 }
  0x7a   : > { %v321_v53 = vadd.f32 %v319_v34, %v315_v8  ;;  %v378_v5 = vmul.f32 %v988_v21, %v293_v28  ;;  %v295_v10 = vand.u32 2147483647, %v288_v37  ;;  %v407_v11 = vmul.f32 %v313_v16, %v294_v45 }
  0x7b   : > { %v401_v6 = vadd.f32 %v399_v58, %v396_v56  ;;  %v414_v13 = vmul.f32 %v322_v2, %v294_v45  ;;  %v370_v7 = vadd.f32 %v368_v55, %v365_v62  ;;  %v376_v9 = vmul.f32 %v986_v20, %v293_v28 }
  0x7c   : > { %v327_v61 = vadd.f32 %v325_v42, %v321_v53  ;;  %v383_v0 = vmul.f32 %v990_v22, %v293_v28  ;;  %v411_v1 = vrot.slane %v409_v60, 1  ;;  %v380_v18 = vrot.slane %v378_v5, 1 }
  0x7d   : > { %v406_v15 = vadd.f32 %v404_v59, %v401_v6  ;;  %v375_v12 = vadd.f32 %v373_v63, %v370_v7  ;;  %v416_v23 = vrot.slane %v414_v13, 2  ;;  %v421_v3 = vmul.f32 %v988_v21, %v295_v10 }
  0x7e   : > { %v330_v14 = vadd.f32 %v329_v49, %v327_v61  ;;  %v385_v2 = vrot.slane %v383_v0, 2  ;;  %v419_v26 = vmul.f32 %v986_v20, %v295_v10  ;;  %v426_v27 = vmul.f32 %v990_v22, %v295_v10 }
  0x7f   : > { %v408_v19 = vadd.f32 %v407_v11, %v406_v15  ;;  %v377_v16 = vadd.f32 %v376_v9, %v375_v12  ;;  %v423_v31 = vrot.slane %v421_v3, 1  ;;  %v441_v34 = vstv %s596_s26 }
  0x80   : > { %v336_v17 = vadd.f32 %v334_v50, %v330_v14  ;;  %v428_v36 = vrot.slane %v426_v27, 2  ;;  %v445_v20 = vstv %s597_s7 }
  0x81   : > { %v413_v25 = vadd.f32 %v411_v1, %v408_v19  ;;  %v382_v4 = vadd.f32 %v380_v18, %v377_v16 }
  0x82   : > { %v342_v24 = vadd.f32 %v340_v57, %v336_v17 }
  0x83   : > { %v418_v30 = vadd.f32 %v416_v23, %v413_v25  ;;  %v387_v33 = vadd.f32 %v385_v2, %v382_v4 }
  0x84   : > { %v344_v28 = vrot.slane %v342_v24, 1  ;;  %v346_v29 = vrot.slane %v342_v24, 2 }
  0x85   : > { %v420_v35 = vadd.f32 %v419_v26, %v418_v30  ;;  %v389_v38 = vrot.slane %v387_v33, 1  ;;  %v391_v39 = vrot.slane %v387_v33, 2 }
  0x86   : > { %v349_v32 = vsel %vm348_vm0, %v342_v24, %v344_v28 }
  0x87   : > { %v351_v21 = vsel %vm350_vm1, %v349_v32, %v346_v29  ;;  %v425_v40 = vadd.f32 %v423_v31, %v420_v35  ;;  %v393_v41 = vsel %vm348_vm0, %v387_v33, %v389_v38 }
  0x88   : > { %v438_v37 = vmax.f32 %v351_v21, 0.0  ;;  %v394_v42 = vsel %vm350_vm1, %v393_v41, %v391_v39 }
  0x89   : > { %v430_v43 = vadd.f32 %v428_v36, %v425_v40  ;;  %v439_v45 = vmax.f32 %v394_v42, 0.0 }
  0x8a   : > { %v442_v22 = vmul.f32 %v441_v34, %v438_v37 }
  0x8b   : > { %v432_v8 = vrot.slane %v430_v43, 1  ;;  %v434_v46 = vrot.slane %v430_v43, 2  ;;  %v443_v48 = vmul.f32 %v441_v34, %v439_v45 }
  0x8c   : > { %v446_v44 = vadd.f32 %v445_v20, %v442_v22 }
  0x8d   : > { %v436_v49 = vsel %vm348_vm0, %v430_v43, %v432_v8  ;;  %v447_v51 = vadd.f32 %v445_v20, %v443_v48 }
  0x8e   : > { %v449_v47 = vsub.f32 0.0, %v446_v44  ;;  %v437_v52 = vsel %vm350_vm1, %v436_v49, %v434_v46 }
  0x8f   : > { %v440_v53 = vmax.f32 %v437_v52, 0.0  ;;  %v450_v54 = vsub.f32 0.0, %v447_v51 }
  0x90   : > { %v452_v50 = vmul.f32 1.442695, %v449_v47 }
  0x91   : > { %v444_v55 = vmul.f32 %v441_v34, %v440_v53  ;;  %v454_v56 = vmul.f32 1.442695, %v450_v54 }
  0x92   : > { %665 = vpow2.f32 %v452_v50 }
  0x93   : > { %v448_v57 = vadd.f32 %v445_v20, %v444_v55  ;;  %667 = vpow2.f32 %v454_v56 }
  0x95   : > { %v451_v58 = vsub.f32 0.0, %v448_v57 }
  0x97   : > { %v456_v59 = vmul.f32 1.442695, %v451_v58 }
  0x99   : > { %669 = vpow2.f32 %v456_v59 }
  0x9f   : > { %v666_v60 = vpop.eup %665 }
  0xa0   : > { %v458_v61 = vadd.f32 1.0, %v666_v60  ;;  %v668_v62 = vpop.eup %667 }
  0xa1   : > { %v459_v63 = vadd.f32 1.0, %v668_v62 }
  0xa2   : > { %671 = vrcp.f32 %v458_v61 }
  0xa3   : > { %673 = vrcp.f32 %v459_v63 }
  0xa6   : > { %v670_v5 = vpop.eup %669 }
  0xa7   : > { %v460_v10 = vadd.f32 1.0, %v670_v5 }
  0xa9   : > { %675 = vrcp.f32 %v460_v10 }
  0xaf   : > { %v672_v6 = vpop.eup %671 }
  0xb0   : > { %467 = vst [vmem:[%s174_s17] sm:$0x7] %v672_v6  ;;  %v674_v11 = vpop.eup %673 }
  0xb1   : > { %468 = vst [vmem:[%s174_s17 + $0x4] sm:$0x7] %v674_v11 }
  0xb6   : > { %v676_v13 = vpop.eup %675 }
  0xb7   : > { %469 = vst [vmem:[%s174_s17 + $0x8] sm:$0x7] %v676_v13 }
  0xb8   : > { %733 = shalt.err (!%p730_p1)
}
  0xb9   : > { %s734_s24 = scalar_lea.hbm %s1018_s4, 192  ;;  %s738_s20 = scalar_lea.hbm %s1063_s2, 384 }
  0xba   : > { %p735_p4 = scmp.ne.s32.totalorder %s1018_s4, %s734_s24  ;;  %p739_p12 = scmp.lt.s32.totalorder %s1018_s4, %s1063_s2 }
  0xbb   : > { %p740_p0 = scmp.lt.s32.totalorder %s738_s20, %s734_s24 }
  0xbc   : > { %p736_p11 = pnand %p735_p4, %p1079_p3 }
  0xbd   : > { %p741_p6 = por %p740_p0, %p739_p12 }
  0xbe   : > { %p737_p5 = pneg %p736_p11 }
  0xc0   : > { %p742_p13 = pnand %p741_p6, %p737_p5 }
  0xc2   : > { %745 = shalt.err (!%p742_p13)
}
  0xc3   : > { %s796_s7 = smov 64   ;;  %s797_s16 = smov 128  }
  0xc4   : > { %s798_s17 = smov 4  }
  0xc5   : > { %608 = dma.vmem_to_hbm [thread:$0]  (%p1079_p3), %s1013_s27, 192, %s1018_s4, %s471_s5, %s796_s7, %s797_s16, %s798_s17  }
  0xc6 PF: > { %s498_s30 = sand.u32 1, %s776_s9   ;;  %p1080_p2 = scmp.ne.s32.totalorder %s1071_s22, 0 }
  0xc7   : > { %p1081_p7 = scmp.ge.s32.totalorder %s788_s12, 2  ;;  %s499_s28 = scalar_lea.sflag [#allocation4], %s498_s30 }
  0xc9   : > { %p619_p8 = pnand %p1081_p7, %p1080_p2 }
  0xcb   : > { %p620_p9 = pneg %p619_p8 }
  0xcd   : > { %771 = dma.done.wait (%p620_p9), %s499_s28, 192  }
  0xce   : > { %773 = vsyncadd (%p620_p9), %s499_s28, 4294967104  ;;  %p16_p10 = scmp.ge.s32.totalorder %s839_s15, 4   ;;  %s1082_s9 = smov %s780_s10 }
  0xcf   : > { %s1083_s10 = smov %s784_s11  ;;  %s1084_s11 = smov %s851_s18 }
  0xd0   : > { %s1085_s12 = smov %s839_s15  ;;  %18 = sbr.rel (!%p16_p10) target bundleno = 6 (0x6), region = 78 }
  0xd5   :  { %504 = vsyncpa [#allocation3], 1 }
  0xd6   :  { %506 = vsyncpa [#allocation3 + $0x1], 1 }
  0xd7   :  { %507 = vsyncpa [#allocation4], 1 }
  0xd8   :  { %509 = vsyncpa [#allocation4 + $0x1], 1 }
  0xd9   :  { %510 = vsyncpa [#allocation5], 1 }
  0xda   :  { %512 = vsyncpa [#allocation5 + $0x1], 1 }

</bundles_post_ra>
